<compile_context>
chip_gen: v7x
topology: tpu7x:2x2x1
jax: 0.10.0
libtpu: 0.0.40
codegen_flags: <defaults>
</compile_context>

<pallas_src>
import functools

import jax
import jax.numpy as jnp
from jax.experimental import pallas as pl
from jax.experimental.pallas import tpu as pltpu


def _round_up(a: int, m: int) -> int:
    return ((a + m - 1) // m) * m


def _char_embed_kernel(ids_ref, x_ref, pre_ref, wx_ref, b_ref, o_ref):
    # ids_ref: [Bt, 1]   int32  (already +1 / length-padded by the wrapper)
    # x_ref:   [Bt, d]   x.dtype (native; cast to bf16 in-kernel, per tile)
    # pre_ref: [Vp, d]   bf16   (= zero-padded  emb_table @ W[:, d:].T)
    # wx_ref:  [d,  d]   bf16   (= W[:, :d].T of the combine Linear)
    # b_ref:   [1,  d]   f32    bias
    # o_ref:   [Bt, d]   x.dtype
    ids = ids_ref[...]                                    # [Bt, 1] int32
    bt = ids.shape[0]
    vp = pre_ref.shape[0]

    # One-hot gather fused with the text half of the Linear on the MXU.
    # NOTE: any id >= Vp (invalid input) yields an all-zero one-hot (embedding
    # silently dropped) rather than an OOB gather; valid ids are 0..V-1 < Vp.
    lane_ids = jax.lax.broadcasted_iota(jnp.int32, (bt, vp), dimension=1)
    onehot = (lane_ids == ids).astype(jnp.bfloat16)       # [Bt, Vp] exact 0/1

    x_bf = x_ref[...].astype(jnp.bfloat16)                # per-tile cast

    # Single f32 accumulator fed by both MXU contractions, then bias.
    acc = jnp.dot(x_bf, wx_ref[...], preferred_element_type=jnp.float32)
    acc = acc + jnp.dot(onehot, pre_ref[...], preferred_element_type=jnp.float32)
    acc = acc + b_ref[...]
    o_ref[...] = acc.astype(o_ref.dtype)


def prepare_kernel_params(params, *, vocab_pad_multiple: int = 128):
    """One-time param prep (transposes / casts / emb@Wt fold). Call once.

    Returns a dict of ARRAYS ONLY (no Python ints) so it can be passed through
    jit without static/dynamic confusion; sizes are recovered from shapes.
    """
    emb = params["embed"].astype(jnp.float32)             # [V, d]
    w = params["combine_w"].astype(jnp.float32)           # [d, 2d] (torch layout)
    bias = params["combine_b"].astype(jnp.float32)        # [d]
    v, d = emb.shape

    wx = jnp.transpose(w[:, :d]).astype(jnp.bfloat16)     # [d, d]
    wt = jnp.transpose(w[:, d:])                          # [d, d] f32
    pre = emb @ wt                                        # [V, d] f32 fold
    v_pad = _round_up(v, vocab_pad_multiple)               # lane-aligned contraction
    pre = jnp.pad(pre, ((0, v_pad - v), (0, 0))).astype(jnp.bfloat16)

    return {
        "wx": wx,                                          # [d, d]   bf16
        "pre": pre,                                        # [Vp, d]  bf16
        "bias": bias.reshape(1, d),                        # [1, d]   f32
    }


@functools.partial(jax.jit, static_argnames=("drop_text_cond", "block_rows"))
def character_embed(x, text, kparams, drop_text_cond: bool = False,
                    block_rows: int = 1024):
    """x: [b, n, d] float, text: [b, m] int -> [b, n, d] (x.dtype)."""
    if drop_text_cond:
        return x

    b, n, d = x.shape
    v_pad, d_pre = kparams["pre"].shape                    # static (from shapes)
    assert d_pre == d, f"dim mismatch: x has d={d}, folded table has d={d_pre}"

    # --- glue: +1, truncate / pad text to seq len n (plain JAX, tiny arrays) ---
    text = text.astype(jnp.int32) + 1
    text = text[:, :n]
    pad_t = n - text.shape[1]
    if pad_t > 0:
        text = jnp.pad(text, ((0, 0), (0, pad_t)), constant_values=0)

    # --- flatten rows; NO cast, NO row padding (reshape is metadata-only) ---
    B = b * n
    x2 = x.reshape(B, d)
    ids = text.reshape(B, 1)

    x_bytes = x.dtype.itemsize
    out_bytes = x_bytes

    # --- honest VMEM accounting (bytes) ---
    per_row = (
        2 * d * x_bytes            # x tile (double-buffered)
        + 2 * 512                  # ids tile: (Bt,1) int32 lane-pads to (8,128) tiles
        + 2 * d * out_bytes        # out tile (double-buffered)
        + v_pad * (2 + 4)          # one-hot (bf16) + iota (int32) intermediates
        + d * (4 + 2)              # f32 accumulator + bf16 x cast
    )
    resident = (
        2 * v_pad * d * 2          # pre (bf16, default double-buffered)
        + 2 * d * d * 2            # wx  (bf16)
        + 2 * 8 * _round_up(d, 128) * 4  # bias (f32, sublane/lane padded)
    )

    # --- tile size: as large as block_rows allows within a ~40 MiB budget ---
    budget = 40 * 1024 * 1024
    bt_req = _round_up(block_rows, 8)
    max_rows = max(8, ((budget - min(resident, budget)) // per_row) // 8 * 8)
    b_tile = min(bt_req, max_rows)
    if B <= b_tile:
        b_tile = B                 # single block == full extent (always legal)

    grid = (pl.cdiv(B, b_tile),)

    vmem_need = resident + b_tile * per_row
    # 48 MiB cap: leaves headroom on v7x (64 MiB/TC); well within v5e/v6e VMEM.
    vmem_limit = int(min(48 * 1024 * 1024,
                         max(32 * 1024 * 1024, vmem_need + (4 << 20))))

    cost = pl.CostEstimate(
        flops=2 * B * d * (d + v_pad),
        transcendentals=0,
        bytes_accessed=(B * d * x_bytes + B * 4 + B * d * out_bytes
                        + v_pad * d * 2 + d * d * 2 + d * 4),
    )

    out = pl.pallas_call(
        _char_embed_kernel,
        out_shape=jax.ShapeDtypeStruct((B, d), x.dtype),
        grid=grid,
        in_specs=[
            pl.BlockSpec((b_tile, 1), lambda i: (i, 0)),   # ids  (streamed)
            pl.BlockSpec((b_tile, d), lambda i: (i, 0)),   # x    (streamed, native dtype)
            pl.BlockSpec((v_pad, d), lambda i: (0, 0)),    # pre  (resident)
            pl.BlockSpec((d, d), lambda i: (0, 0)),        # wx   (resident)
            pl.BlockSpec((1, d), lambda i: (0, 0)),        # bias (resident)
        ],
        out_specs=pl.BlockSpec((b_tile, d), lambda i: (i, 0)),
        compiler_params=pltpu.CompilerParams(
            dimension_semantics=("parallel",),
            vmem_limit_bytes=vmem_limit,
        ),
        cost_estimate=cost,
    )(ids, x2, kparams["pre"], kparams["wx"], kparams["bias"])

    return out.reshape(b, n, d)


def init_params(key, dim, num_embeds):
    """Raw PyTorch-layout params: Embedding(num_embeds+1, dim), Linear(2d->d)."""
    k1, k2, k3 = jax.random.split(key, 3)
    V = num_embeds + 1
    embed = jax.random.normal(k1, (V, dim), dtype=jnp.float32)
    bound = 1.0 / jnp.sqrt(2.0 * dim)
    combine_w = jax.random.uniform(k2, (dim, 2 * dim), jnp.float32, -bound, bound)
    combine_b = jax.random.uniform(k3, (dim,), jnp.float32, -bound, bound)
    return {"embed": embed, "combine_w": combine_w, "combine_b": combine_b}


def _reference(x, text, params):
    b, n, d = x.shape
    text = text.astype(jnp.int32) + 1
    text = text[:, :n]
    text = jnp.pad(text, ((0, 0), (0, n - text.shape[1])), constant_values=0)
    t_emb = params["embed"][text]                             # [b, n, d]
    cat = jnp.concatenate([x, t_emb], axis=-1)                # [b, n, 2d]
    return cat @ params["combine_w"].T + params["combine_b"]  # [b, n, d]


if __name__ == "__main__":
    key = jax.random.PRNGKey(0)
    kx, kt, kp = jax.random.split(key, 3)

    b, n, d = 2, 8, 32
    num_embeds = 16

    x = jax.random.normal(kx, (b, n, d), dtype=jnp.float32)
    text = jax.random.randint(kt, (b, n), 0, num_embeds, dtype=jnp.int32)

    params = init_params(kp, d, num_embeds)
    kparams = prepare_kernel_params(params)          # one-time fold/cast/pad

    out = character_embed(x, text, kparams, drop_text_cond=False)
    out = jax.block_until_ready(out)

    ref = _reference(x, text, params)
    assert out.shape == (b, n, d)
    assert out.dtype == x.dtype
    # bf16 matmul operands (f32 accumulation) -> loosened tolerance vs f32 ref.
    assert jnp.allclose(out, ref, atol=5e-2, rtol=5e-2), "mismatch vs reference"

    # drop_text_cond path: identity on x (same dtype as kernel path).
    out_drop = character_embed(x, text, kparams, drop_text_cond=True)
    assert jnp.allclose(jax.block_until_ready(out_drop), x)

    print("KERNEL_OK")
</pallas_src>

<mosaic_0001>
module attributes {stable_mosaic.version = 11 : i64} {
  func.func @_char_embed_kernel(%arg0: i32, %arg1: memref<16x1xi32, #tpu.memory_space<vmem>>, %arg2: memref<16x32xf32, #tpu.memory_space<vmem>>, %arg3: memref<128x32xbf16, #tpu.memory_space<vmem>>, %arg4: memref<32x32xbf16, #tpu.memory_space<vmem>>, %arg5: memref<1x32xf32, #tpu.memory_space<vmem>>, %arg6: memref<16x32xf32, #tpu.memory_space<vmem>>) attributes {dimension_semantics = [#tpu.dimension_semantics<parallel>], iteration_bounds = array<i64: 1>, scalar_prefetch = 0 : i64, scratch_operands = 0 : i64, tpu.core_type = #tpu.core_type<tc>, window_params = [{transform_indices = @transform_0, window_bounds = array<i64: 16, 1>}, {transform_indices = @transform_1, window_bounds = array<i64: 16, 32>}, {pipeline_mode = #tpu.pipeline_mode<synchronous>, transform_indices = @transform_2, window_bounds = array<i64: 128, 32>}, {pipeline_mode = #tpu.pipeline_mode<synchronous>, transform_indices = @transform_3, window_bounds = array<i64: 32, 32>}, {pipeline_mode = #tpu.pipeline_mode<synchronous>, transform_indices = @transform_4, window_bounds = array<i64: 1, 32>}, {transform_indices = @transform_5, window_bounds = array<i64: 16, 32>}]} {
    %c0 = arith.constant 0 : index
    %c0_0 = arith.constant 0 : index
    %0 = vector.load %arg1[%c0, %c0_0] : memref<16x1xi32, #tpu.memory_space<vmem>>, vector<16x1xi32>
    %1 = tpu.iota {dimensions = array<i32: 1>} : vector<16x128xi32>
    %2 = vector.broadcast %0 : vector<16x1xi32> to vector<16x128xi32>
    %3 = arith.cmpi eq, %1, %2 : vector<16x128xi32>
    %4 = arith.extui %3 : vector<16x128xi1> to vector<16x128xi32>
    %5 = arith.sitofp %4 : vector<16x128xi32> to vector<16x128xf32>
    %6 = arith.truncf %5 : vector<16x128xf32> to vector<16x128xbf16>
    %c0_1 = arith.constant 0 : index
    %c0_2 = arith.constant 0 : index
    %7 = vector.load %arg2[%c0_1, %c0_2] : memref<16x32xf32, #tpu.memory_space<vmem>>, vector<16x32xf32>
    %8 = arith.truncf %7 : vector<16x32xf32> to vector<16x32xbf16>
    %c0_3 = arith.constant 0 : index
    %c0_4 = arith.constant 0 : index
    %9 = vector.load %arg4[%c0_3, %c0_4] : memref<32x32xbf16, #tpu.memory_space<vmem>>, vector<32x32xbf16>
    %cst = arith.constant dense<0.000000e+00> : vector<16x32xf32>
    %10 = tpu.matmul %8, %9, %cst {dimension_numbers = #tpu.dot_dimension_numbers<[1], [0], [0], [1], [0, 0, 1, 1], [], []>} : vector<16x32xbf16>, vector<32x32xbf16>, vector<16x32xf32> -> vector<16x32xf32>
    %c0_5 = arith.constant 0 : index
    %c0_6 = arith.constant 0 : index
    %11 = vector.load %arg3[%c0_5, %c0_6] : memref<128x32xbf16, #tpu.memory_space<vmem>>, vector<128x32xbf16>
    %cst_7 = arith.constant dense<0.000000e+00> : vector<16x32xf32>
    %12 = tpu.matmul %6, %11, %cst_7 {dimension_numbers = #tpu.dot_dimension_numbers<[1], [0], [0], [1], [0, 0, 1, 1], [], []>} : vector<16x128xbf16>, vector<128x32xbf16>, vector<16x32xf32> -> vector<16x32xf32>
    %13 = arith.addf %10, %12 : vector<16x32xf32>
    %c0_8 = arith.constant 0 : index
    %c0_9 = arith.constant 0 : index
    %14 = vector.load %arg5[%c0_8, %c0_9] : memref<1x32xf32, #tpu.memory_space<vmem>>, vector<1x32xf32>
    %15 = vector.broadcast %14 : vector<1x32xf32> to vector<16x32xf32>
    %16 = arith.addf %13, %15 : vector<16x32xf32>
    %c0_10 = arith.constant 0 : index
    %c0_11 = arith.constant 0 : index
    %17 = vector.load %arg6[%c0_10, %c0_11] : memref<16x32xf32, #tpu.memory_space<vmem>>, vector<16x32xf32>
    tpu.vector_store %arg6[%c0_10, %c0_11], %16 {strides = array<i32>} : memref<16x32xf32, #tpu.memory_space<vmem>>, vector<16x32xf32>,
    return
  }
  func.func @transform_0(%arg0: i32) -> (i32, i32) {
    %c0_i32 = arith.constant 0 : i32
    %c0_i32_0 = arith.constant 0 : i32
    return %arg0, %c0_i32 : i32, i32
  }
  func.func @transform_1(%arg0: i32) -> (i32, i32) {
    %c0_i32 = arith.constant 0 : i32
    %c0_i32_0 = arith.constant 0 : i32
    return %arg0, %c0_i32 : i32, i32
  }
  func.func @transform_2(%arg0: i32) -> (i32, i32) {
    %c0_i32 = arith.constant 0 : i32
    %c0_i32_0 = arith.constant 0 : i32
    %c0_i32_1 = arith.constant 0 : i32
    return %c0_i32, %c0_i32_0 : i32, i32
  }
  func.func @transform_3(%arg0: i32) -> (i32, i32) {
    %c0_i32 = arith.constant 0 : i32
    %c0_i32_0 = arith.constant 0 : i32
    %c0_i32_1 = arith.constant 0 : i32
    return %c0_i32, %c0_i32_0 : i32, i32
  }
  func.func @transform_4(%arg0: i32) -> (i32, i32) {
    %c0_i32 = arith.constant 0 : i32
    %c0_i32_0 = arith.constant 0 : i32
    %c0_i32_1 = arith.constant 0 : i32
    return %c0_i32, %c0_i32_0 : i32, i32
  }
  func.func @transform_5(%arg0: i32) -> (i32, i32) {
    %c0_i32 = arith.constant 0 : i32
    %c0_i32_0 = arith.constant 0 : i32
    return %arg0, %c0_i32 : i32, i32
  }
}

</mosaic_0001>

<bundles_post_ra>
// kernel: character_embed.1
= control target key start
LH: loop header
LB: loop body
LE: loop exit
PB: predicated region body
PF: predicated region fallthrough
CT: control target
= control target key end

     0   :  { %v333_v1 = vmov 0   ;;  %v334_v2 = vmov 0.0   ;;  %vm335_vm0 = vmmov 0   ;;  %s430_s0 = inlined_call_operand.vmem [shape: s32[16,1], index: 0, kind: input, shape index: {}]   ;;  %s431_s1 = inlined_call_operand.vmem [shape: f32[16,32], index: 1, kind: input, shape index: {}]   ;;  %s432_s2 = inlined_call_operand.vmem [shape: bf16[128,32], index: 2, kind: input, shape index: {}]   ;;  %s433_s3 = inlined_call_operand.vmem [shape: bf16[32,32], index: 3, kind: input, shape index: {}]   ;;  %s434_s4 = inlined_call_operand.vmem [shape: f32[1,32], index: 4, kind: input, shape index: {}]   ;;  %s435_s5 = inlined_call_operand.hbm [shape: f32[16,32], index: 5, kind: output, shape index: {}]  }
   0x1   :  { %v22_v0 = vld [vmem:[%s430_s0] sm:$0xff]  ;;  %298 = vset.pattern.permute.xlu0 %v333_v1  ;;  %263 = vmatprep.subr.bf16.mxu0 %v334_v2  ;;  %v23_v4 = vld [vmem:[%s430_s0 + $0x8] sm:$0xff]  ;;  %v301_v6 = vld [vmem:[%s432_s2 + $0x10] sm:$0xff]  }
   0x2   :  { %v299_v3 = vld [vmem:[%s432_s2] sm:$0xff]   ;;  %27 = vperm.xlu0 %298, %v22_v0   ;;  %283 = vmatprep.subr.bf16.mxu1 %v334_v2  ;;  %v300_v5 = vld [vmem:[%s432_s2 + $0x8] sm:$0xff]   ;;  %v302_v10 = vld [vmem:[%s432_s2 + $0x18] sm:$0xff]  }
   0x3   :  { %264 = vmatpush3.bf16.msra.mxu0 %v299_v3  ;;  %287 = vmatprep.mubr.msk.bf16.mxu1 %vm335_vm0, %v334_v2  ;;  %v305_v7 = vld [vmem:[%s433_s3] sm:$0xff]   ;;  %v307_v8 = vld [vmem:[%s433_s3 + $0x8] sm:$0xff]  }
   0x4   :  { %265 = vmatprep.subr.bf16.mxu0 %v334_v2  ;;  %279 = vmatprep.mubr.msk.bf16.mxu0 %vm335_vm0, %v334_v2  ;;  %v39_v9 = vld [vmem:[%s431_s1] sm:$0xff]  ;;  %v40_v11 = vld [vmem:[%s431_s1 + $0x8] sm:$0xff] }
   0x5   :  { %284 = vmatpush3.bf16.msra.mxu1 %v305_v7 }
   0x6   :  { %30 = vperm.xlu0 %298, %v23_v4   ;;  %285 = vmatprep.subr.bf16.mxu1 %v334_v2 }
   0x7   :  { %266 = vmatpush3.bf16.msra.mxu0 %v300_v5 }
   0x8   :  { %267 = vmatprep.subr.bf16.mxu0 %v334_v2 }
   0xb   :  { %268 = vmatpush3.bf16.msra.mxu0 %v301_v6 }
   0xc   :  { %10 = vsyncpa [#allocation3], 0  ;;  %269 = vmatprep.subr.bf16.mxu0 %v334_v2  ;;  %v41_v12 = vpack.c.bf16 %v40_v11, %v39_v9  ;;  %286 = vmatpush3.bf16.msra.mxu1 %v307_v8  ;;  %vm163_vm1 = vcmask 261120   ;;  %v303_v13 = vld [vmem:[%s432_s2 + $0x20] sm:$0xff]   ;;  %v304_v14 = vld [vmem:[%s432_s2 + $0x28] sm:$0xff]   ;;  %v24_v17 = vlaneseq }
   0xd   :  { %v306_v15 = vld [vmem:[%s432_s2 + $0x30] sm:$0xff]   ;;  %v308_v16 = vld [vmem:[%s432_s2 + $0x38] sm:$0xff]   ;;  %v336_v21 = vmov 1.0|1.0   ;;  %v250_v27 = vld [vmem:[%s434_s4] ss:$0 sm:$0xff] }
   0xe   :  { %v25_v19 = vand.u32 127, %v24_v17  ;;  %s337_s2 = smov [#allocation2]  }
   0xf   :  { %270 = vmatpush3.bf16.msra.mxu0 %v302_v10  ;;  %288 = vmatmul.mubr.msk.bf16.vlgmr.msra.gmra.mrb[0].mxu1 %vm163_vm1, %v41_v12  ;;  %s224_s20 = sshll.u32 %s337_s2, 4  ;;  %s225_s20 = int_to_ptr.vmem [resolvable:$true] %s224_s20 }
  0x10   :  { %271 = vmatprep.subr.bf16.mxu0 %v334_v2  ;;  %s309_s21 = scalar_lea.vmem %s225_s20, 256  ;;  %p314_p1 = scmp.lt.s32.totalorder %s225_s20, %s225_s20 }
  0x11   :  { %p310_p0 = scmp.ne.s32.totalorder %s225_s20, %s309_s21  ;;  %p315_p2 = scmp.lt.s32.totalorder %s309_s21, %s309_s21 }
  0x13   :  { %272 = vmatpush3.bf16.msra.mxu0 %v303_v13  ;;  %p316_p3 = por %p315_p2, %p314_p1 }
  0x14   :  { %273 = vmatprep.subr.bf16.mxu0 %v334_v2 }
  0x15   :  { %p317_p4 = pnand %p316_p3, %p310_p0 }
  0x17   :  { %274 = vmatpush3.bf16.msra.mxu0 %v304_v14 }
  0x18   :  { %275 = vmatprep.subr.bf16.mxu0 %v334_v2 }
  0x1b   :  { %276 = vmatpush3.bf16.msra.mxu0 %v306_v15 }
  0x1c   :  { %277 = vmatprep.subr.bf16.mxu0 %v334_v2 }
  0x1f   :  { %278 = vmatpush3.bf16.msra.mxu0 %v308_v16 }
  0x81   :  { %v28_v18 = vpop.permute.xlu0 %27 }
  0x82   :  { %vm32_vm2 = vcmp.eq.s32.totalorder %v25_v19, %v28_v18 }
  0x85   :  { %v31_v20 = vpop.permute.xlu0 %30 }
  0x86   :  { %vm33_vm3 = vcmp.eq.s32.totalorder %v25_v19, %v31_v20 }
  0x87   :  { %vm245_vm4 = vmpackc.low %vm33_vm3, %vm32_vm2 }
  0x88   :  { %280 = vmatmul.mubr.msk.bf16.vlgmr.msra.gmra.mrb[0].mxu0 %vm245_vm4, %v336_v21 }
  0xe2   :  { %v201_v22 = vpop.f32.mrb[0].mxu1 }
  0xe3   :  { %v289_v23 = vpop.f32.mrb[1].mxu1 }
  0xe4   :  { %v204_v24 = vpop.f32.mrb[2].mxu1 }
  0xe5   :  { %v290_v25 = vpop.f32.mrb[3].mxu1 }
 0x15b   :  { %v144_v26 = vpop.f32.mrb[0].mxu0 }
 0x15c   :  { %v202_v28 = vadd.f32 %v201_v22, %v144_v26  ;;  %v281_v29 = vpop.f32.mrb[1].mxu0 }
 0x15d   :  { %v147_v30 = vpop.f32.mrb[2].mxu0 }
 0x15e   :  { %v215_v31 = vadd.f32 %v250_v27, %v202_v28  ;;  %v205_v32 = vadd.f32 %v204_v24, %v147_v30  ;;  %v282_v33 = vpop.f32.mrb[3].mxu0 }
 0x160   :  { %217 = vst.msk [vmem:[#allocation2] sm:$0xff] %vm163_vm1, %v215_v31  ;;  %v216_v34 = vadd.f32 %v250_v27, %v205_v32 }
 0x162   :  { %218 = vst.msk [vmem:[#allocation2 + $0x8] sm:$0xff] %vm163_vm1, %v216_v34 }
 0x163   :  { %320 = shalt.err (!%p317_p4)
}
 0x164   :  { %s321_s23 = scalar_lea.hbm %s435_s5, 256 }
 0x165   :  { %p322_p5 = scmp.ne.s32.totalorder %s435_s5, %s321_s23  ;;  %p325_p6 = scmp.lt.u32.totalorder %s321_s23, %s435_s5 }
 0x167   :  { %p327_p7 = pnand %p325_p6, %p322_p5 }
 0x169   :  { %330 = shalt.err (!%p327_p7)
}
 0x16a   :  { %s338_s28 = smov 128   ;;  %s339_s29 = smov 8  }
 0x16b   :  { %230 = dma.vmem_to_hbm [thread:$0]  %s225_s20, 256, %s435_s5, [#allocation3], %s338_s28, %s338_s28, %s339_s29  }
 0x16c   :  { %331 = dma.done.wait [#allocation3], 256  }
 0x16d   :  { %332 = vsyncadd [#allocation3], 4294967040 }
 0x16e   :  { %234 = vsyncpa [#allocation3], 1 }

</bundles_post_ra>
